<compile_context>
chip_gen: v7x
topology: tpu7x:2x2x1
jax: 0.10.0
libtpu: 0.0.40
codegen_flags: <defaults>
</compile_context>

<pallas_src>
import jax
import jax.numpy as jnp
from jax.experimental import pallas as pl
from jax.experimental.pallas import tpu as pltpu


C_IN = 3             # conv input channels
TS_MAX = 2048        # max rows-of-128 per block: (3, 2048, 128) f32 input tile = 3 MiB
SPLIT_MIN_ROWS = 512 # only force a 2-way spatial split (v7x: 2 TCs) on big N==1 inputs


def conv1x1_silu_kernel(wb_ref, x_ref, o_ref):
    """wb_ref: SMEM (4,) = [w0, w1, w2, bias]; x_ref: VMEM (C_IN, TS, 128); o_ref: VMEM (TS, 128)."""
    # 1x1 conv over 3 channels == explicit 3-term FMA on dense (TS, 128) tiles (pure VPU).
    v1 = (x_ref[0] * wb_ref[0]
          + x_ref[1] * wb_ref[1]
          + x_ref[2] * wb_ref[2]
          + wb_ref[3])
    o_ref[...] = v1 * jax.nn.sigmoid(v1)          # v1 * sigmoid(v1)


def _choose_ts(n, rows):
    """Rows-of-128 per block."""
    ts = min(TS_MAX, rows)
    if ts < rows:
        ts = max(8, (ts // 8) * 8)                # block sublane dim must be a multiple of 8
    # v7x has 2 TensorCores: when the batch axis gives no parallelism, split the spatial
    # axis into >=2 blocks -- but only for big inputs (on single-TC v5e/v6e extra grid
    # steps are pure ~0.35 us/step overhead).
    if n == 1 and rows >= SPLIT_MIN_ROWS and pl.cdiv(rows, ts) < 2:
        half = pl.cdiv(rows, 2)
        ts = max(8, pl.cdiv(half, 8) * 8)
    return ts


def conv1x1_silu(x_nchw, weight, bias):
    """x_nchw: (N, C_IN, H, W) f32; weight: (1, C_IN, 1, 1); bias: (1,)."""
    n, c, h, w = x_nchw.shape
    assert c == C_IN
    m = h * w
    rows = pl.cdiv(m, 128)

    x3 = x_nchw.reshape(n, c, m).astype(jnp.float32)
    padded = rows * 128 != m
    if padded:
        # Ragged H*W fallback: pad flat spatial up to a lane multiple (extra HBM pass;
        # never hit when H*W is a multiple of 128, e.g. the 64x64 case).
        x3 = jnp.pad(x3, ((0, 0), (0, 0), (0, rows * 128 - m)))
    # Free reshape: lane/sublane-dense (rows, 128) spatial layout, no transpose.
    x4 = x3.reshape(n, c, rows, 128)

    ts = _choose_ts(n, rows)
    wb = jnp.concatenate([weight.reshape(C_IN), bias.reshape(1)]).astype(jnp.float32)

    out = pl.pallas_call(
        conv1x1_silu_kernel,
        out_shape=jax.ShapeDtypeStruct((n, rows, 128), jnp.float32),
        grid_spec=pltpu.PrefetchScalarGridSpec(
            num_scalar_prefetch=0,
            grid=(n, pl.cdiv(rows, ts)),
            in_specs=[
                pl.BlockSpec(memory_space=pltpu.SMEM),                         # [w0,w1,w2,b]
                pl.BlockSpec((None, C_IN, ts, 128), lambda b, i: (b, 0, i, 0)),  # x tile
            ],
            out_specs=pl.BlockSpec((None, ts, 128), lambda b, i: (b, i, 0)),
        ),
        compiler_params=pltpu.CompilerParams(
            dimension_semantics=("parallel", "parallel"),
            vmem_limit_bytes=32 * 1024 * 1024),
    )(wb, x4)

    out = out.reshape(n, 1, rows * 128)
    if padded:
        out = out[:, :, :m]
    return out.reshape(n, 1, h, w)


def reference(x_nchw, weight, bias):
    v1 = jnp.einsum("nchw,oc->nohw", x_nchw, weight.reshape(1, C_IN)) + bias.reshape(1, 1, 1, 1)
    return v1 * jax.nn.sigmoid(v1)


if __name__ == "__main__":
    key = jax.random.PRNGKey(0)
    kx, kw, kb = jax.random.split(key, 3)

    # Shapes consistent with the module spec: x1 = torch.randn(1, 3, 64, 64).
    x = jax.random.normal(kx, (1, 3, 64, 64), dtype=jnp.float32)

    # Deterministic Conv2d(3, 1, 1) parameter init (uniform, fan_in = 3).
    bound = 1.0 / (C_IN ** 0.5)
    weight = jax.random.uniform(kw, (1, C_IN, 1, 1), minval=-bound, maxval=bound, dtype=jnp.float32)
    bias = jax.random.uniform(kb, (1,), minval=-bound, maxval=bound, dtype=jnp.float32)

    out = jax.block_until_ready(conv1x1_silu(x, weight, bias))
    ref = reference(x, weight, bias)
    assert out.shape == (1, 1, 64, 64)
    assert jnp.allclose(out, ref, atol=1e-5, rtol=1e-5)

    # Ragged-spatial check (H*W not a multiple of 128): exercises the padded fallback.
    x_r = jax.random.normal(kx, (2, 3, 50, 50), dtype=jnp.float32)
    out_r = jax.block_until_ready(conv1x1_silu(x_r, weight, bias))
    assert jnp.allclose(out_r, reference(x_r, weight, bias), atol=1e-5, rtol=1e-5)

    print("KERNEL_OK")
</pallas_src>

<mosaic_0001>
module attributes {stable_mosaic.version = 11 : i64} {
  func.func @conv1x1_silu_kernel(%arg0: i32, %arg1: i32, %arg2: memref<4xf32, #tpu.memory_space<smem>>, %arg3: memref<1x3x32x128xf32, #tpu.memory_space<vmem>>, %arg4: memref<1x32x128xf32, #tpu.memory_space<vmem>>) attributes {dimension_semantics = [#tpu.dimension_semantics<parallel>, #tpu.dimension_semantics<parallel>], iteration_bounds = array<i64: 1, 1>, scalar_prefetch = 0 : i64, scratch_operands = 0 : i64, tpu.core_type = #tpu.core_type<tc>, window_params = [{transform_indices = @transform_0, window_bounds = array<i64: 4>}, {transform_indices = @transform_1, window_bounds = array<i64: 1, 3, 32, 128>}, {transform_indices = @transform_2, window_bounds = array<i64: 1, 32, 128>}]} {
    %c0 = arith.constant 0 : index
    %c0_0 = arith.constant 0 : index
    %c0_1 = arith.constant 0 : index
    %c0_2 = arith.constant 0 : index
    %0 = vector.load %arg3[%c0, %c0_0, %c0_1, %c0_2] : memref<1x3x32x128xf32, #tpu.memory_space<vmem>>, vector<1x1x32x128xf32>
    %1 = vector.shape_cast %0 : vector<1x1x32x128xf32> to vector<32x128xf32>
    %c0_3 = arith.constant 0 : index
    %2 = memref.load %arg2[%c0_3] : memref<4xf32, #tpu.memory_space<smem>>
    %3 = vector.broadcast %2 : f32 to vector<32x128xf32>
    %4 = arith.mulf %1, %3 : vector<32x128xf32>
    %c0_4 = arith.constant 0 : index
    %c1 = arith.constant 1 : index
    %c0_5 = arith.constant 0 : index
    %c0_6 = arith.constant 0 : index
    %5 = vector.load %arg3[%c0_4, %c1, %c0_5, %c0_6] : memref<1x3x32x128xf32, #tpu.memory_space<vmem>>, vector<1x1x32x128xf32>
    %6 = vector.shape_cast %5 : vector<1x1x32x128xf32> to vector<32x128xf32>
    %c1_7 = arith.constant 1 : index
    %7 = memref.load %arg2[%c1_7] : memref<4xf32, #tpu.memory_space<smem>>
    %8 = vector.broadcast %7 : f32 to vector<32x128xf32>
    %9 = arith.mulf %6, %8 : vector<32x128xf32>
    %10 = arith.addf %4, %9 : vector<32x128xf32>
    %c0_8 = arith.constant 0 : index
    %c2 = arith.constant 2 : index
    %c0_9 = arith.constant 0 : index
    %c0_10 = arith.constant 0 : index
    %11 = vector.load %arg3[%c0_8, %c2, %c0_9, %c0_10] : memref<1x3x32x128xf32, #tpu.memory_space<vmem>>, vector<1x1x32x128xf32>
    %12 = vector.shape_cast %11 : vector<1x1x32x128xf32> to vector<32x128xf32>
    %c2_11 = arith.constant 2 : index
    %13 = memref.load %arg2[%c2_11] : memref<4xf32, #tpu.memory_space<smem>>
    %14 = vector.broadcast %13 : f32 to vector<32x128xf32>
    %15 = arith.mulf %12, %14 : vector<32x128xf32>
    %16 = arith.addf %10, %15 : vector<32x128xf32>
    %c3 = arith.constant 3 : index
    %17 = memref.load %arg2[%c3] : memref<4xf32, #tpu.memory_space<smem>>
    %18 = vector.broadcast %17 : f32 to vector<32x128xf32>
    %19 = arith.addf %16, %18 : vector<32x128xf32>
    %20 = arith.negf %19 : vector<32x128xf32>
    %21 = math.exp %20 : vector<32x128xf32>
    %cst = arith.constant 1.000000e+00 : f32
    %22 = vector.broadcast %cst : f32 to vector<32x128xf32>
    %23 = arith.addf %22, %21 : vector<32x128xf32>
    %24 = arith.divf %22, %23 : vector<32x128xf32>
    %25 = arith.mulf %19, %24 : vector<32x128xf32>
    %c0_12 = arith.constant 0 : index
    %c0_13 = arith.constant 0 : index
    %c0_14 = arith.constant 0 : index
    %26 = vector.load %arg4[%c0_12, %c0_13, %c0_14] : memref<1x32x128xf32, #tpu.memory_space<vmem>>, vector<1x32x128xf32>
    %27 = vector.shape_cast %26 : vector<1x32x128xf32> to vector<32x128xf32>
    %28 = vector.shape_cast %25 : vector<32x128xf32> to vector<1x32x128xf32>
    tpu.vector_store %arg4[%c0_12, %c0_13, %c0_14], %28 {strides = array<i32>} : memref<1x32x128xf32, #tpu.memory_space<vmem>>, vector<1x32x128xf32>,
    return
  }
  func.func @transform_0(%arg0: i32, %arg1: i32) -> i32 {
    %c0_i32 = arith.constant 0 : i32
    %c0_i32_0 = arith.constant 0 : i32
    return %c0_i32 : i32
  }
  func.func @transform_1(%arg0: i32, %arg1: i32) -> (i32, i32, i32, i32) {
    %c0_i32 = arith.constant 0 : i32
    %c0_i32_0 = arith.constant 0 : i32
    %c0_i32_1 = arith.constant 0 : i32
    return %arg0, %c0_i32, %arg1, %c0_i32_0 : i32, i32, i32, i32
  }
  func.func @transform_2(%arg0: i32, %arg1: i32) -> (i32, i32, i32) {
    %c0_i32 = arith.constant 0 : i32
    %c0_i32_0 = arith.constant 0 : i32
    return %arg0, %arg1, %c0_i32 : i32, i32, i32
  }
}

</mosaic_0001>

<bundles_post_ra>
// kernel: tpu_custom_call.1
= control target key start
LH: loop header
LB: loop body
LE: loop exit
PB: predicated region body
PF: predicated region fallthrough
CT: control target
= control target key end

     0   :  { %7 = vsyncpa [#allocation5], 0  ;;  %s283_s0 = inlined_call_operand.hbm [shape: f32[4], index: 0, kind: input, shape index: {}]   ;;  %s284_s1 = inlined_call_operand.hbm [shape: f32[1,3,32,128], index: 1, kind: input, shape index: {}]   ;;  %s285_s2 = inlined_call_operand.hbm [shape: f32[1,32,128], index: 2, kind: output, shape index: {}]  }
   0x1   :  { %8 = vsyncpa [#allocation3], 0 }
   0x2   :  { %9 = vsyncpa [#allocation4], 0  ;;  %s161_s11 = scalar_lea.hbm %s283_s0, 16 }
   0x3   :  { %p162_p0 = scmp.ne.s32.totalorder %s283_s0, %s161_s11  ;;  %p165_p1 = scmp.lt.u32.totalorder %s161_s11, %s283_s0 }
   0x5   :  { %p167_p2 = pnand %p165_p1, %p162_p0 }
   0x7   :  { %170 = shalt.err (!%p167_p2)
}
   0x8   :  { %s221_s16 = smov [#allocation2]   ;;  %s222_s19 = smov [#allocation6]  }
   0x9   :  { %17 = dma.hbm_to_smem %s283_s0, 16, %s221_s16, [#allocation5]  }
   0xa   :  { %s23_s20 = sshll.u32 %s222_s19, 4  ;;  %s171_s23 = scalar_lea.hbm %s284_s1, 1536  ;;  %s24_s20 = int_to_ptr.vmem [resolvable:$true] %s23_s20 }
   0xb   :  { %p172_p3 = scmp.ne.s32.totalorder %s284_s1, %s171_s23  ;;  %p175_p4 = scmp.lt.u32.totalorder %s171_s23, %s284_s1 }
   0xd   :  { %p177_p5 = pnand %p175_p4, %p172_p3 }
   0xf   :  { %180 = shalt.err (!%p177_p5)
}
  0x10   :  { %s181_s28 = scalar_lea.vmem %s24_s20, 1536  ;;  %p186_p7 = scmp.lt.s32.totalorder %s24_s20, %s24_s20 }
  0x11   :  { %p182_p6 = scmp.ne.s32.totalorder %s24_s20, %s181_s28  ;;  %p187_p8 = scmp.lt.s32.totalorder %s181_s28, %s181_s28 }
  0x13   :  { %p188_p9 = por %p187_p8, %p186_p7 }
  0x15   :  { %p189_p10 = pnand %p188_p9, %p182_p6 }
  0x17   :  { %192 = shalt.err (!%p189_p10)
}
  0x18   :  { %s223_s0 = smov 128   ;;  %s224_s29 = smov 8  }
  0x19   :  { %29 = dma.hbm_to_vmem [thread:$0]  %s284_s1, 1536, %s24_s20, [#allocation3], %s223_s0, %s223_s0, %s224_s29  }
  0x1a   :  { %215 = dma.done.wait [#allocation5], 16  }
  0x1b   :  { %216 = vsyncadd [#allocation5], 4294967280 }
  0x1c   :  { %217 = dma.done.wait [#allocation3], 1536  }
  0x1d   :  { %218 = vsyncadd [#allocation3], 4294965760 }
  0x1e   :  { %36 = sfence }
  0x1f   :  { %s41_s4 = sld [smem:[#allocation2]]  ;;  %s133_s5 = sld [smem:[#allocation2 + $0x1]]  ;;  %v37_v0 = vld [vmem:[#allocation6] sm:$0xff]  ;;  %v38_v3 = vld [vmem:[#allocation6 + $0x8] sm:$0xff]  ;;  %v39_v8 = vld [vmem:[#allocation6 + $0x10] sm:$0xff] }
  0x20   :  { %s134_s6 = sld [smem:[#allocation2 + $0x2]]  ;;  %s135_s7 = sld [smem:[#allocation2 + $0x3]]  ;;  %v48_v1 = vld [vmem:[#allocation6 + $0x20] sm:$0xff]  ;;  %v49_v4 = vld [vmem:[#allocation6 + $0x28] sm:$0xff]  ;;  %v50_v9 = vld [vmem:[#allocation6 + $0x30] sm:$0xff] }
  0x21   :  { %v63_v2 = vld [vmem:[#allocation6 + $0x40] sm:$0xff]  ;;  %v64_v5 = vld [vmem:[#allocation6 + $0x48] sm:$0xff]  ;;  %v65_v10 = vld [vmem:[#allocation6 + $0x50] sm:$0xff]  ;;  %s225_s1 = smov [#allocation7]  }
  0x22   :  { %v40_v15 = vld [vmem:[#allocation6 + $0x18] sm:$0xff]  ;;  %s120_s8 = sshll.u32 %s225_s1, 4  ;;  %s121_s8 = int_to_ptr.vmem [resolvable:$true] %s120_s8 }
  0x23   :  { %v51_v16 = vld [vmem:[#allocation6 + $0x38] sm:$0xff]  ;;  %s193_s9 = scalar_lea.vmem %s121_s8, 512  ;;  %p198_p12 = scmp.lt.s32.totalorder %s121_s8, %s121_s8 }
  0x24   :  { %v66_v17 = vld [vmem:[#allocation6 + $0x58] sm:$0xff]  ;;  %p194_p11 = scmp.ne.s32.totalorder %s121_s8, %s193_s9  ;;  %p199_p13 = scmp.lt.s32.totalorder %s193_s9, %s193_s9 }
  0x25   :  { %v42_v6 = vstv %s41_s4  ;;  %v53_v7 = vstv %s133_s5 }
  0x26   :  { %v43_v11 = vmul.f32 %v42_v6, %v37_v0  ;;  %v54_v12 = vmul.f32 %v53_v7, %v48_v1  ;;  %v68_v13 = vstv %s134_s6  ;;  %v78_v14 = vstv %s135_s7  ;;  %p200_p0 = por %p199_p13, %p198_p12 }
  0x27   :  { %v69_v18 = vmul.f32 %v68_v13, %v63_v2  ;;  %v44_v19 = vmul.f32 %v42_v6, %v38_v3  ;;  %v55_v20 = vmul.f32 %v53_v7, %v49_v4  ;;  %v70_v21 = vmul.f32 %v68_v13, %v64_v5 }
  0x28   :  { %v58_v22 = vadd.f32 %v54_v12, %v43_v11  ;;  %v45_v23 = vmul.f32 %v42_v6, %v39_v8  ;;  %v56_v24 = vmul.f32 %v53_v7, %v50_v9  ;;  %v71_v25 = vmul.f32 %v68_v13, %v65_v10  ;;  %p201_p1 = pnand %p200_p0, %p194_p11 }
  0x29   :  { %v59_v26 = vadd.f32 %v55_v20, %v44_v19  ;;  %v46_v27 = vmul.f32 %v42_v6, %v40_v15  ;;  %v57_v28 = vmul.f32 %v53_v7, %v51_v16  ;;  %v72_v29 = vmul.f32 %v68_v13, %v66_v17 }
  0x2a   :  { %v73_v30 = vadd.f32 %v69_v18, %v58_v22  ;;  %v60_v31 = vadd.f32 %v56_v24, %v45_v23 }
  0x2b   :  { %v74_v32 = vadd.f32 %v70_v21, %v59_v26  ;;  %v61_v33 = vadd.f32 %v57_v28, %v46_v27 }
  0x2c   :  { %v79_v34 = vadd.f32 %v78_v14, %v73_v30  ;;  %v75_v35 = vadd.f32 %v71_v25, %v60_v31 }
  0x2d   :  { %v80_v36 = vadd.f32 %v78_v14, %v74_v32  ;;  %v76_v37 = vadd.f32 %v72_v29, %v61_v33 }
  0x2e   :  { %v136_v38 = vmul.f32 -1.442695, %v79_v34  ;;  %v81_v39 = vadd.f32 %v78_v14, %v75_v35 }
  0x2f   :  { %v137_v40 = vmul.f32 -1.442695, %v80_v36  ;;  %v82_v41 = vadd.f32 %v78_v14, %v76_v37 }
  0x30   :  { %145 = vpow2.f32 %v136_v38  ;;  %v138_v42 = vmul.f32 -1.442695, %v81_v39 }
  0x31   :  { %147 = vpow2.f32 %v137_v40  ;;  %v139_v43 = vmul.f32 -1.442695, %v82_v41 }
  0x32   :  { %149 = vpow2.f32 %v138_v42 }
  0x33   :  { %151 = vpow2.f32 %v139_v43 }
  0x3a   :  { %v146_v44 = vpop.eup %145 }
  0x3b   :  { %v148_v45 = vpop.eup %147  ;;  %v95_v46 = vadd.f32 1.0, %v146_v44 }
  0x3c   :  { %v150_v47 = vpop.eup %149  ;;  %v96_v48 = vadd.f32 1.0, %v148_v45 }
  0x3d   :  { %v152_v49 = vpop.eup %151  ;;  %153 = vrcp.f32 %v95_v46  ;;  %v97_v50 = vadd.f32 1.0, %v150_v47 }
  0x3e   :  { %155 = vrcp.f32 %v96_v48  ;;  %v98_v51 = vadd.f32 1.0, %v152_v49 }
  0x3f   :  { %157 = vrcp.f32 %v97_v50 }
  0x40   :  { %159 = vrcp.f32 %v98_v51 }
  0x47   :  { %v154_v52 = vpop.eup %153 }
  0x48   :  { %v156_v53 = vpop.eup %155  ;;  %v107_v54 = vmul.f32 %v154_v52, %v79_v34 }
  0x49   :  { %v158_v55 = vpop.eup %157  ;;  %v108_v56 = vmul.f32 %v156_v53, %v80_v36 }
  0x4a   :  { %v160_v57 = vpop.eup %159  ;;  %111 = vst [vmem:[#allocation7] sm:$0xff] %v107_v54  ;;  %v109_v58 = vmul.f32 %v158_v55, %v81_v39 }
  0x4b   :  { %112 = vst [vmem:[#allocation7 + $0x8] sm:$0xff] %v108_v56  ;;  %v110_v59 = vmul.f32 %v160_v57, %v82_v41 }
  0x4c   :  { %113 = vst [vmem:[#allocation7 + $0x10] sm:$0xff] %v109_v58 }
  0x4d   :  { %114 = vst [vmem:[#allocation7 + $0x18] sm:$0xff] %v110_v59 }
  0x4e   :  { %204 = shalt.err (!%p201_p1)
}
  0x4f   :  { %s205_s12 = scalar_lea.hbm %s285_s2, 512 }
  0x50   :  { %p206_p2 = scmp.ne.s32.totalorder %s285_s2, %s205_s12  ;;  %p209_p3 = scmp.lt.u32.totalorder %s205_s12, %s285_s2 }
  0x52   :  { %p211_p4 = pnand %p209_p3, %p206_p2 }
  0x54   :  { %214 = shalt.err (!%p211_p4)
}
  0x55   :  { %126 = dma.vmem_to_hbm [thread:$0]  %s121_s8, 512, %s285_s2, [#allocation4], %s223_s0, %s223_s0, %s224_s29  }
  0x56   :  { %219 = dma.done.wait [#allocation4], 512  }
  0x57   :  { %220 = vsyncadd [#allocation4], 4294966784 }
  0x58   :  { %130 = vsyncpa [#allocation3], 1 }
  0x59   :  { %131 = vsyncpa [#allocation4], 1 }
  0x5a   :  { %132 = vsyncpa [#allocation5], 1 }

</bundles_post_ra>
